<compile_context>
chip_gen: v6e
topology: v6e:2x2x1
jax: 0.10.0
libtpu: 0.0.40
codegen_flags: <defaults>
</compile_context>

<pallas_src>
import jax
import jax.numpy as jnp
from jax.experimental import pallas as pl
from jax.experimental.pallas import tpu as pltpu


def _round_up(x, m):
    return ((x + m - 1) // m) * m


def _linear_kernel_single_k(x_ref, w_ref, b_ref, o_ref):
    # x_ref: (tm, K), w_ref: (K, tn), b_ref: (1, tn), o_ref: (tm, tn)
    acc = jnp.dot(x_ref[...], w_ref[...], preferred_element_type=jnp.float32)
    o_ref[...] = (acc + b_ref[...].astype(jnp.float32)).astype(o_ref.dtype)


def _linear_kernel_acc(x_ref, w_ref, b_ref, o_ref, acc_ref):
    # x_ref: (tm, tk), w_ref: (tk, tn), b_ref: (1, tn), o_ref: (tm, tn)
    k = pl.program_id(2)

    @pl.when(k == 0)
    def _init():
        acc_ref[...] = jnp.zeros_like(acc_ref)

    acc_ref[...] += jnp.dot(
        x_ref[...], w_ref[...], preferred_element_type=jnp.float32
    )

    @pl.when(k == pl.num_programs(2) - 1)
    def _finalize():
        o_ref[...] = (
            acc_ref[...] + b_ref[...].astype(jnp.float32)
        ).astype(o_ref.dtype)


def _tiled_linear(x2, w, b, *, tm_target=512, tn_target=256, tk_target=512):
    """x2: (M, K), w: (K, N), b: (1, N) -> (M, N), tiled MXU matmul + bias."""
    M, K = x2.shape
    Kw, N = w.shape
    assert K == Kw and b.shape == (1, N)

    # Lane-dense tiles: K/N tiles multiples of 128, M tile multiple of 8.
    tm = min(tm_target, _round_up(M, 8))
    tn = min(tn_target, _round_up(N, 128))
    tk = min(tk_target, _round_up(K, 128))

    M_pad = _round_up(M, tm)
    N_pad = _round_up(N, tn)
    K_pad = _round_up(K, tk)

    if (M_pad, K_pad) != (M, K):
        x2 = jnp.pad(x2, ((0, M_pad - M), (0, K_pad - K)))
    if (K_pad, N_pad) != (K, N):
        w = jnp.pad(w, ((0, K_pad - K), (0, N_pad - N)))
    if N_pad != N:
        b = jnp.pad(b, ((0, 0), (0, N_pad - N)))

    single_k = K_pad == tk
    itemsize = jnp.dtype(x2.dtype).itemsize
    out_itemsize = jnp.dtype(x2.dtype).itemsize

    # VMEM budget: double-buffered input/output/bias tiles (+ f32 accumulator
    # scratch for the K-tiled path), with headroom; capped well under v7x's
    # 64 MiB physical VMEM.
    vmem_needed = (
        2 * (tm * tk + tk * tn + tn) * itemsize   # double-buffered input tiles
        + 2 * tm * tn * out_itemsize              # double-buffered output tile
        + (0 if single_k else tm * tn * 4)        # f32 accumulator scratch
    )
    vmem_limit = int(min(48 << 20, max(2 * vmem_needed, 8 << 20)))

    cost = pl.CostEstimate(
        flops=2 * M_pad * N_pad * K_pad,
        transcendentals=0,
        bytes_accessed=(
            M_pad * K_pad * itemsize
            + K_pad * N_pad * itemsize
            + N_pad * itemsize
            + M_pad * N_pad * out_itemsize
        ),
    )

    if single_k:
        # K fits in one tile: no reduction axis, no scratch, fully fused.
        grid = (M_pad // tm, N_pad // tn)
        out = pl.pallas_call(
            _linear_kernel_single_k,
            out_shape=jax.ShapeDtypeStruct((M_pad, N_pad), x2.dtype),
            grid_spec=pltpu.PrefetchScalarGridSpec(
                num_scalar_prefetch=0,
                grid=grid,
                in_specs=[
                    pl.BlockSpec((tm, tk), lambda i, j: (i, 0)),
                    pl.BlockSpec((tk, tn), lambda i, j: (0, j)),
                    pl.BlockSpec((1, tn), lambda i, j: (0, j)),
                ],
                out_specs=pl.BlockSpec((tm, tn), lambda i, j: (i, j)),
            ),
            compiler_params=pltpu.CompilerParams(
                dimension_semantics=("parallel", "parallel"),
                vmem_limit_bytes=vmem_limit,
            ),
            cost_estimate=cost,
        )(x2, w, b)
    else:
        # K-tiled reduction: K innermost ("arbitrary"), accumulator resident.
        grid = (M_pad // tm, N_pad // tn, K_pad // tk)
        out = pl.pallas_call(
            _linear_kernel_acc,
            out_shape=jax.ShapeDtypeStruct((M_pad, N_pad), x2.dtype),
            grid_spec=pltpu.PrefetchScalarGridSpec(
                num_scalar_prefetch=0,
                grid=grid,
                in_specs=[
                    pl.BlockSpec((tm, tk), lambda i, j, k: (i, k)),
                    pl.BlockSpec((tk, tn), lambda i, j, k: (k, j)),
                    pl.BlockSpec((1, tn), lambda i, j, k: (0, j)),
                ],
                out_specs=pl.BlockSpec((tm, tn), lambda i, j, k: (i, j)),
                scratch_shapes=[pltpu.VMEM((tm, tn), jnp.float32)],
            ),
            compiler_params=pltpu.CompilerParams(
                dimension_semantics=("parallel", "parallel", "arbitrary"),
                vmem_limit_bytes=vmem_limit,
            ),
            cost_estimate=cost,
        )(x2, w, b)

    if (M_pad, N_pad) != (M, N):
        out = out[:M, :N]
    return out


def time_distributed_linear(x, w, b):
    """TimeDistributed(Linear)(x): (B, T, ..., D_in) -> (B, T, ..., D_out).

    w is stored as (D_in, D_out) (PyTorch keeps (out, in) and does x @ W.T;
    we pre-transpose so the kernel does x @ W + b).  b is (1, D_out).
    """
    if x.ndim <= 2:
        raise RuntimeError(f"No dimension to distribute: {x.shape}")
    d_in = x.shape[-1]
    d_out = w.shape[1]
    lead = x.shape[:-1]

    # TimeDistributed._reshape_tensor squashes (B, T) -> B*T; Linear is
    # pointwise over all leading dims, so fold them all into M for the kernel.
    x2 = x.reshape(-1, d_in)
    out2 = _tiled_linear(x2, w, b)

    # un-squash: new_size = inputs[-1].size()[:2] + reshaped_outputs.size()[1:]
    return out2.reshape(*lead, d_out)


if __name__ == "__main__":
    B, T, D_IN, D_OUT = 2, 8, 32, 64

    key = jax.random.PRNGKey(0)
    kx, kw, kb = jax.random.split(key, 3)

    x = jax.random.normal(kx, (B, T, D_IN), dtype=jnp.float32)
    # deterministic "Linear" params (synthetic, not a checkpoint load)
    w = jax.random.normal(kw, (D_IN, D_OUT), dtype=jnp.float32) * (1.0 / D_IN**0.5)
    b = jax.random.normal(kb, (1, D_OUT), dtype=jnp.float32) * 0.1

    # Main path: TimeDistributed(Linear) with small shapes (single-K kernel).
    out = time_distributed_linear(x, w, b)
    out = jax.block_until_ready(out)

    ref = (x.reshape(B * T, D_IN) @ w + b).reshape(B, T, D_OUT)
    assert out.shape == (B, T, D_OUT)
    assert jnp.allclose(out, ref, atol=1e-5, rtol=1e-5)

    # Also exercise the K-tiled accumulator path with a forced small tk.
    k2, k3 = jax.random.split(kb)
    x_big = jax.random.normal(k2, (B * T, 256), dtype=jnp.float32)
    w_big = jax.random.normal(k3, (256, 128), dtype=jnp.float32) * (1.0 / 256**0.5)
    b_big = jnp.zeros((1, 128), dtype=jnp.float32)
    out_big = jax.block_until_ready(
        _tiled_linear(x_big, w_big, b_big, tk_target=128)
    )
    ref_big = x_big @ w_big + b_big
    assert jnp.allclose(out_big, ref_big, atol=1e-4, rtol=1e-4)

    print("KERNEL_OK")
</pallas_src>

<mosaic_0001>
module attributes {stable_mosaic.version = 11 : i64} {
  func.func @_linear_kernel_single_k(%arg0: i32, %arg1: i32, %arg2: memref<16x128xf32, #tpu.memory_space<vmem>>, %arg3: memref<128x128xf32, #tpu.memory_space<vmem>>, %arg4: memref<1x128xf32, #tpu.memory_space<vmem>>, %arg5: memref<16x128xf32, #tpu.memory_space<vmem>>) attributes {dimension_semantics = [#tpu.dimension_semantics<parallel>, #tpu.dimension_semantics<parallel>], iteration_bounds = array<i64: 1, 1>, scalar_prefetch = 0 : i64, scratch_operands = 0 : i64, tpu.core_type = #tpu.core_type<tc>, window_params = [{transform_indices = @transform_0, window_bounds = array<i64: 16, 128>}, {transform_indices = @transform_1, window_bounds = array<i64: 128, 128>}, {transform_indices = @transform_2, window_bounds = array<i64: 1, 128>}, {transform_indices = @transform_3, window_bounds = array<i64: 16, 128>}]} {
    %c0 = arith.constant 0 : index
    %c0_0 = arith.constant 0 : index
    %0 = vector.load %arg2[%c0, %c0_0] : memref<16x128xf32, #tpu.memory_space<vmem>>, vector<16x128xf32>
    %c0_1 = arith.constant 0 : index
    %c0_2 = arith.constant 0 : index
    %1 = vector.load %arg3[%c0_1, %c0_2] : memref<128x128xf32, #tpu.memory_space<vmem>>, vector<128x128xf32>
    %cst = arith.constant dense<0.000000e+00> : vector<16x128xf32>
    %2 = tpu.matmul %0, %1, %cst {dimension_numbers = #tpu.dot_dimension_numbers<[1], [0], [0], [1], [0, 0, 1, 1], [], []>} : vector<16x128xf32>, vector<128x128xf32>, vector<16x128xf32> -> vector<16x128xf32>
    %c0_3 = arith.constant 0 : index
    %c0_4 = arith.constant 0 : index
    %3 = vector.load %arg4[%c0_3, %c0_4] : memref<1x128xf32, #tpu.memory_space<vmem>>, vector<1x128xf32>
    %4 = vector.broadcast %3 : vector<1x128xf32> to vector<16x128xf32>
    %5 = arith.addf %2, %4 : vector<16x128xf32>
    %c0_5 = arith.constant 0 : index
    %c0_6 = arith.constant 0 : index
    %6 = vector.load %arg5[%c0_5, %c0_6] : memref<16x128xf32, #tpu.memory_space<vmem>>, vector<16x128xf32>
    tpu.vector_store %arg5[%c0_5, %c0_6], %5 {strides = array<i32>} : memref<16x128xf32, #tpu.memory_space<vmem>>, vector<16x128xf32>,
    return
  }
  func.func @transform_0(%arg0: i32, %arg1: i32) -> (i32, i32) {
    %c0_i32 = arith.constant 0 : i32
    %c0_i32_0 = arith.constant 0 : i32
    return %arg0, %c0_i32 : i32, i32
  }
  func.func @transform_1(%arg0: i32, %arg1: i32) -> (i32, i32) {
    %c0_i32 = arith.constant 0 : i32
    %c0_i32_0 = arith.constant 0 : i32
    return %c0_i32, %arg1 : i32, i32
  }
  func.func @transform_2(%arg0: i32, %arg1: i32) -> (i32, i32) {
    %c0_i32 = arith.constant 0 : i32
    %c0_i32_0 = arith.constant 0 : i32
    return %c0_i32, %arg1 : i32, i32
  }
  func.func @transform_3(%arg0: i32, %arg1: i32) -> (i32, i32) {
    %c0_i32 = arith.constant 0 : i32
    return %arg0, %arg1 : i32, i32
  }
}

</mosaic_0001>

<bundles_post_ra>
// kernel: tpu_custom_call.1
= control target key start
LH: loop header
LB: loop body
LE: loop exit
PB: predicated region body
PF: predicated region fallthrough
CT: control target
= control target key end

     0   :  { %8 = vsyncpa [#allocation3], 0  ;;  %s334_s0 = inlined_call_operand.hbm [shape: f32[16,128], index: 0, kind: input, shape index: {}]   ;;  %s335_s1 = inlined_call_operand.hbm [shape: f32[128,128], index: 1, kind: input, shape index: {}]   ;;  %s336_s2 = inlined_call_operand.vmem [shape: f32[1,128], index: 2, kind: input, shape index: {}]   ;;  %s337_s3 = inlined_call_operand.hbm [shape: f32[16,128], index: 3, kind: output, shape index: {}]  }
   0x1   :  { %9 = vsyncpa [#allocation6], 0 }
   0x2   :  { %10 = vsyncpa [#allocation4], 0  ;;  %s288_s12 = smov [#allocation2]  }
   0x3   :  { %s16_s13 = sshll.u32 %s288_s12, 4  ;;  %s17_s13 = int_to_ptr.vmem [resolvable:$true] %s16_s13 }
   0x4   :  { %s230_s14 = scalar_lea.vmem %s17_s13, 256  ;;  %p235_p1 = scmp.lt.s32.totalorder %s17_s13, %s17_s13 }
   0x5   :  { %p231_p0 = scmp.ne.s32.totalorder %s17_s13, %s230_s14  ;;  %p236_p2 = scmp.lt.s32.totalorder %s230_s14, %s230_s14 }
   0x7   :  { %p237_p3 = por %p236_p2, %p235_p1 }
   0x9   :  { %p238_p4 = pnand %p237_p3, %p231_p0 }
   0xb   :  { %241 = shalt.err (!%p238_p4)
}
   0xc   :  { %s289_s15 = smov 128   ;;  %s290_s16 = smov 8  }
   0xd   :  { %22 = dma.hbm_to_vmem [thread:$0]  %s334_s0, 256, %s17_s13, [#allocation3], %s289_s15, %s289_s15, %s290_s16  }
   0xe   :  { %s291_s19 = smov [#allocation5]  }
   0xf   :  { %s28_s20 = sshll.u32 %s291_s19, 4  ;;  %s29_s20 = int_to_ptr.vmem [resolvable:$true] %s28_s20 }
  0x10   :  { %s250_s21 = scalar_lea.vmem %s29_s20, 2048  ;;  %p255_p6 = scmp.lt.s32.totalorder %s29_s20, %s29_s20 }
  0x11   :  { %p251_p5 = scmp.ne.s32.totalorder %s29_s20, %s250_s21  ;;  %p256_p7 = scmp.lt.s32.totalorder %s250_s21, %s250_s21 }
  0x13   :  { %p257_p8 = por %p256_p7, %p255_p6 }
  0x15   :  { %p258_p9 = pnand %p257_p8, %p251_p5 }
  0x17   :  { %261 = shalt.err (!%p258_p9)
}
  0x18   :  { %34 = dma.hbm_to_vmem [thread:$0]  %s335_s1, 2048, %s29_s20, [#allocation6], %s289_s15, %s289_s15, %s290_s16  }
  0x19   :  { %282 = dma.done.wait [#allocation3], 256  }
  0x1a   :  { %283 = vsyncadd [#allocation3], 4294967040 }
  0x1b   :  { %284 = dma.done.wait [#allocation6], 2048  }
  0x1c   :  { %285 = vsyncadd [#allocation6], 4294965248  ;;  %v60_v0 = vld [vmem:[#allocation5 + $0x78] sm:$0xff]  ;;  %v59_v1 = vld [vmem:[#allocation5 + $0x70] sm:$0xff]  ;;  %s292_s24 = smov [#allocation7]  }
  0x1d   :  { %182 = vmatprep.subr.mxu0 %v60_v0  ;;  %v58_v2 = vld [vmem:[#allocation5 + $0x68] sm:$0xff]  ;;  %v57_v3 = vld [vmem:[#allocation5 + $0x60] sm:$0xff]  ;;  %v43_v4 = vld [vmem:[#allocation2] sm:$0xff]  ;;  %s150_s25 = sshll.u32 %s292_s24, 4  ;;  %s151_s25 = int_to_ptr.vmem [resolvable:$true] %s150_s25 }
  0x1e   :  { %183 = vmatpush3.msra.mxu0 %v60_v0  ;;  %v56_v5 = vld [vmem:[#allocation5 + $0x58] sm:$0xff]  ;;  %214 = vmatprep.mubr.f32.mxu0 %v43_v4  ;;  %v55_v6 = vld [vmem:[#allocation5 + $0x50] sm:$0xff]  ;;  %v54_v7 = vld [vmem:[#allocation5 + $0x48] sm:$0xff]  ;;  %s262_s26 = scalar_lea.vmem %s151_s25, 256  ;;  %p267_p11 = scmp.lt.s32.totalorder %s151_s25, %s151_s25 }
  0x1f   :  { %184 = vmatprep.subr.mxu0 %v59_v1  ;;  %v53_v8 = vld [vmem:[#allocation5 + $0x40] sm:$0xff]  ;;  %v52_v9 = vld [vmem:[#allocation5 + $0x38] sm:$0xff]  ;;  %v51_v10 = vld [vmem:[#allocation5 + $0x30] sm:$0xff]  ;;  %p263_p10 = scmp.ne.s32.totalorder %s151_s25, %s262_s26  ;;  %p268_p12 = scmp.lt.s32.totalorder %s262_s26, %s262_s26 }
  0x20   :  { %185 = vmatpush3.msra.mxu0 %v59_v1  ;;  %v50_v11 = vld [vmem:[#allocation5 + $0x28] sm:$0xff]  ;;  %v49_v12 = vld [vmem:[#allocation5 + $0x20] sm:$0xff]  ;;  %v48_v13 = vld [vmem:[#allocation5 + $0x18] sm:$0xff] }
  0x21   :  { %186 = vmatprep.subr.mxu0 %v58_v2  ;;  %v47_v14 = vld [vmem:[#allocation5 + $0x10] sm:$0xff]  ;;  %v46_v15 = vld [vmem:[#allocation5 + $0x8] sm:$0xff]  ;;  %v45_v16 = vld [vmem:[#allocation5] sm:$0xff]  ;;  %p269_p13 = por %p268_p12, %p267_p11 }
  0x22   :  { %187 = vmatpush3.msra.mxu0 %v58_v2  ;;  %v44_v17 = vld [vmem:[#allocation2 + $0x8] sm:$0xff]  ;;  %v163_v18 = vld [vmem:[%s336_s2] ss:$0 sm:$0xff] }
  0x23   :  { %188 = vmatprep.subr.mxu0 %v57_v3  ;;  %p270_p0 = pnand %p269_p13, %p263_p10 }
  0x24   :  { %189 = vmatpush3.msra.mxu0 %v57_v3 }
  0x25   :  { %190 = vmatprep.subr.mxu0 %v56_v5 }
  0x26   :  { %191 = vmatpush3.msra.mxu0 %v56_v5 }
  0x27   :  { %192 = vmatprep.subr.mxu0 %v55_v6 }
  0x28   :  { %193 = vmatpush3.msra.mxu0 %v55_v6 }
  0x29   :  { %194 = vmatprep.subr.mxu0 %v54_v7 }
  0x2a   :  { %195 = vmatpush3.msra.mxu0 %v54_v7 }
  0x2b   :  { %196 = vmatprep.subr.mxu0 %v53_v8 }
  0x2c   :  { %197 = vmatpush3.msra.mxu0 %v53_v8 }
  0x2d   :  { %198 = vmatprep.subr.mxu0 %v52_v9 }
  0x2e   :  { %199 = vmatpush3.msra.mxu0 %v52_v9 }
  0x2f   :  { %200 = vmatprep.subr.mxu0 %v51_v10 }
  0x30   :  { %201 = vmatpush3.msra.mxu0 %v51_v10 }
  0x31   :  { %202 = vmatprep.subr.mxu0 %v50_v11 }
  0x32   :  { %203 = vmatpush3.msra.mxu0 %v50_v11 }
  0x33   :  { %204 = vmatprep.subr.mxu0 %v49_v12 }
  0x34   :  { %205 = vmatpush3.msra.mxu0 %v49_v12 }
  0x35   :  { %206 = vmatprep.subr.mxu0 %v48_v13 }
  0x36   :  { %207 = vmatpush3.msra.mxu0 %v48_v13 }
  0x37   :  { %208 = vmatprep.subr.mxu0 %v47_v14 }
  0x38   :  { %209 = vmatpush3.msra.mxu0 %v47_v14 }
  0x39   :  { %210 = vmatprep.subr.mxu0 %v46_v15 }
  0x3a   :  { %211 = vmatpush3.msra.mxu0 %v46_v15 }
  0x3b   :  { %212 = vmatprep.subr.mxu0 %v45_v16 }
  0x3c   :  { %213 = vmatpush3.msra.mxu0 %v45_v16 }
  0x3d   :  { %215 = vmatmul.mubr.f32.vlgmr.msra.gmra.mxu0 %v44_v17 }
  0xfd   :  { %v216_v19 = vpop.f32.mrf.mxu0 }
  0xfe   :  { %v140_v20 = vadd.f32 %v216_v19, %v163_v18 }
  0xff   :  { %v134_v21 = vpop.f32.mrf.mxu0 }
 0x100   :  { %144 = vst [vmem:[#allocation7 + $0x8] sm:$0xff] %v140_v20  ;;  %v135_v22 = vadd.f32 %v163_v18, %v134_v21 }
 0x102   :  { %143 = vst [vmem:[#allocation7] sm:$0xff] %v135_v22 }
 0x103   :  { %273 = shalt.err (!%p270_p0)
}
 0x104   :  { %156 = dma.vmem_to_hbm [thread:$0]  %s151_s25, 256, %s337_s3, [#allocation4], %s289_s15, %s289_s15, %s290_s16  }
 0x105   :  { %286 = dma.done.wait [#allocation4], 256  }
 0x106   :  { %287 = vsyncadd [#allocation4], 4294967040 }
 0x107   :  { %160 = vsyncpa [#allocation3], 1 }
 0x108   :  { %161 = vsyncpa [#allocation6], 1 }
 0x109   :  { %162 = vsyncpa [#allocation4], 1 }

</bundles_post_ra>
